<compile_context>
chip_gen: v6e
topology: v6e:2x2x1
jax: 0.10.0
libtpu: 0.0.40
codegen_flags: <defaults>
</compile_context>

<pallas_src>
import functools

import jax
import jax.numpy as jnp
from jax.experimental import pallas as pl
from jax.experimental.pallas import tpu as pltpu


_MAX_BLOCK_BYTES = 4 * 1024 * 1024      # per-step input block target (sweep 2-8 MiB)
_TC_CAP = 16384                         # cap on lanes (frames) per tile (value size)
_VMEM_LIMIT_BYTES = 32 * 1024 * 1024    # >= default scoped VMEM on v5e/v6e/v7x


def _cdiv(a: int, b: int) -> int:
    return -(-a // b)


def _round_up(x: int, m: int) -> int:
    return _cdiv(x, m) * m


def _frame_mean_kernel(x_ref, tail_ref, o_ref, *scratch, hop, win, q, r, tc, tqb):
    """One frame tile.

    x_ref:    (hop, tc)   chunks [t*tc, (t+1)*tc)            (chunks on lanes)
    tail_ref: (hop, tqb)  chunks [(t+1)*tc, (t+1)*tc + tqb)  (tiny overlap block)
    o_ref:    (1, tc)     frame means for frames [t*tc, (t+1)*tc)
    scratch:  cat_a (1, tc+tqb) iff q > 0, cat_b (1, tc+tqb) iff q > 0 and r > 0
    """
    if q == 0:
        # win < hop: each frame is just the prefix-r mean of its own chunk.
        acc = jnp.sum(x_ref[0:r, :], axis=0, keepdims=True)
    else:
        cat_a = scratch[0]
        cat_b = scratch[1] if r > 0 else None

        # --- per-chunk sums: sublane reductions -> lane-major results ---
        if r > 0:
            b_main = jnp.sum(x_ref[0:r, :], axis=0, keepdims=True)       # (1, tc)
            b_tail = jnp.sum(tail_ref[0:r, :], axis=0, keepdims=True)    # (1, tqb)
            cat_b[0:1, 0:tc] = b_main
            cat_b[0:1, tc:tc + tqb] = b_tail
            cat_a[0:1, 0:tc] = b_main + jnp.sum(
                x_ref[r:hop, :], axis=0, keepdims=True)
            cat_a[0:1, tc:tc + tqb] = b_tail + jnp.sum(
                tail_ref[r:hop, :], axis=0, keepdims=True)
        else:
            cat_a[0:1, 0:tc] = jnp.sum(x_ref[...], axis=0, keepdims=True)
            cat_a[0:1, tc:tc + tqb] = jnp.sum(tail_ref[...], axis=0, keepdims=True)

        # --- assemble frame sums: out[i] = sum_{d<q} A[i+d] + [r>0]*B[i+q] ---
        if q <= 16:
            acc = cat_a[0:1, 0:tc]
            for d in range(1, q):
                acc = acc + cat_a[0:1, d:d + tc]
        else:
            # two-level partial sums: O(q/8) shifted adds, no cumsum cancellation.
            group = 8
            nb = q // group
            ws = tc + (nb - 1) * group
            s = cat_a[0:1, 0:ws]
            for d in range(1, group):
                s = s + cat_a[0:1, d:d + ws]
            acc = s[:, 0:tc]
            for b in range(1, nb):
                acc = acc + s[:, b * group:b * group + tc]
            for d in range(nb * group, q):
                acc = acc + cat_a[0:1, d:d + tc]
        if r > 0:
            acc = acc + cat_b[0:1, q:q + tc]

    o_ref[...] = acc * jnp.float32(1.0 / win)


@functools.partial(jax.jit, static_argnums=(1, 2))
def label_alignment(vector: jax.Array, hop_size: int, win_size: int) -> jax.Array:
    """Pallas implementation of LabelAlignment.forward for a 1-D label vector."""
    hop = int(hop_size)
    win = int(win_size)
    assert hop >= 1 and win >= 1
    vector = jnp.asarray(vector, dtype=jnp.float32)
    assert vector.ndim == 1
    length = vector.shape[0]
    assert length >= 1

    # --- _pad_vector geometry (edge padding; left gets the extra sample) ---
    total_len = _cdiv(length, hop) * hop
    pad_len = total_len - length
    right = pad_len // 2
    left = right + (pad_len % 2)
    assert win <= total_len, "win_size must not exceed the padded length"
    n_frames = (total_len - win) // hop + 1

    # --- frame decomposition: win = q*hop + r ---
    q, r = divmod(win, hop)
    n_tail = q if r > 0 else q - 1             # chunks a frame needs past its tile
    tqb = 128 * _cdiv(max(n_tail, 1), 128)     # lane-dense tail block width

    # --- tile sizing: frames == chunks == lanes per tile ---
    hop_pad = _round_up(hop, 8)                # sublane-padded rows resident in VMEM
    tc_budget = max(128, (_MAX_BLOCK_BYTES // (hop_pad * 4)) // 128 * 128)
    tc_half = _round_up(_cdiv(n_frames, 2), 128)   # keep >= 2 grid steps when possible
    tc_max = max(128, min(tc_budget, _TC_CAP, tc_half))
    n_tiles = _cdiv(n_frames, tc_max)
    tc = max(_round_up(_cdiv(n_frames, n_tiles), tqb), tqb)
    n_tiles = _cdiv(n_frames, tc)
    tail_stride = tc // tqb

    n_chunks = n_tiles * tc + tqb              # slack read only by discarded frames
    total_padded = n_chunks * hop

    # Single fused pad + reshape + transpose pass building the chunk-major view.
    # The first `left` / trailing samples reproduce the module's edge padding;
    # the extra slack is edge-replicated too and only feeds discarded frames.
    padded = jnp.pad(vector, (left, total_padded - length - left), mode="edge")
    x2d = jnp.transpose(padded.reshape(n_chunks, hop))      # (hop, n_chunks)

    kernel = functools.partial(_frame_mean_kernel, hop=hop, win=win,
                               q=q, r=r, tc=tc, tqb=tqb)
    scratch_shapes = []
    if q > 0:
        scratch_shapes.append(pltpu.VMEM((1, tc + tqb), jnp.float32))
        if r > 0:
            scratch_shapes.append(pltpu.VMEM((1, tc + tqb), jnp.float32))

    out = pl.pallas_call(
        kernel,
        out_shape=jax.ShapeDtypeStruct((1, n_tiles * tc), jnp.float32),
        grid=(n_tiles,),
        in_specs=[
            # main block: chunks [t*tc, (t+1)*tc)
            pl.BlockSpec((hop, tc), lambda t: (0, t)),
            # tail block: first tqb chunks past the tile (same array, tiny block)
            pl.BlockSpec((hop, tqb), lambda t: (0, (t + 1) * tail_stride)),
        ],
        out_specs=pl.BlockSpec((1, tc), lambda t: (0, t)),
        scratch_shapes=scratch_shapes,
        compiler_params=pltpu.CompilerParams(
            dimension_semantics=("parallel",),
            vmem_limit_bytes=_VMEM_LIMIT_BYTES,
        ),
        cost_estimate=pl.CostEstimate(
            flops=2 * total_padded + (q + 1) * n_tiles * tc,
            transcendentals=0,
            bytes_accessed=4 * (hop * n_tiles * (tc + tqb) + n_tiles * tc),
        ),
    )(x2d, x2d)

    return out[0, :n_frames]


def _reference(vector, hop_size, win_size):
    """Pure-JAX reference matching the PyTorch module."""
    vector = jnp.asarray(vector, dtype=jnp.float32)
    length = vector.shape[0]
    total_len = _cdiv(length, hop_size) * hop_size
    pad_len = total_len - length
    right = pad_len // 2
    left = right + (pad_len % 2)
    padded = jnp.pad(vector, (left, right), mode="edge")
    n_frames = (total_len - win_size) // hop_size + 1
    idx = jnp.arange(n_frames)[:, None] * win_size * 0 \
        + jnp.arange(n_frames)[:, None] * hop_size + jnp.arange(win_size)[None, :]
    return padded[idx].mean(axis=-1)


if __name__ == "__main__":
    configs = [
        (4, 8, 37),         # win = 2*hop, odd pad -> left/right edge-padding split
        (4, 10, 4099),      # win % hop != 0, multi-tile grid
        (8, 8, 100),        # win == hop
        (8, 4, 61),         # win < hop (prefix-only path, q == 0)
        (2, 50, 523),       # large q = 25 -> two-level partial-sum path, 2 tiles
        (160, 400, 16000),  # STFT-like hop/win ratio
    ]
    key = jax.random.PRNGKey(0)
    for hop, win, L in configs:
        key, sub = jax.random.split(key)
        # Sample-wise labels in [0, 1] (e.g. fake-speech probability per sample).
        vec = jax.random.uniform(sub, (L,), dtype=jnp.float32)

        out = jax.block_until_ready(label_alignment(vec, hop, win))
        ref = _reference(vec, hop, win)

        assert out.shape == ref.shape, (hop, win, L, out.shape, ref.shape)
        assert jnp.allclose(out, ref, atol=1e-5, rtol=1e-5), (
            hop, win, L, float(jnp.max(jnp.abs(out - ref))))

    print("KERNEL_OK")
</pallas_src>

<mosaic_0001>
module attributes {stable_mosaic.version = 11 : i64} {
  func.func @_frame_mean_kernel(%arg0: i32, %arg1: memref<4x128xf32, #tpu.memory_space<vmem>>, %arg2: memref<4x128xf32, #tpu.memory_space<vmem>>, %arg3: memref<1x128xf32, #tpu.memory_space<vmem>>, %arg4: memref<1x256xf32, #tpu.memory_space<vmem>>) attributes {dimension_semantics = [#tpu.dimension_semantics<parallel>], iteration_bounds = array<i64: 1>, scalar_prefetch = 0 : i64, scratch_operands = 1 : i64, tpu.core_type = #tpu.core_type<tc>, window_params = [{transform_indices = @transform_0, window_bounds = array<i64: 4, 128>}, {transform_indices = @transform_1, window_bounds = array<i64: 4, 128>}, {transform_indices = @transform_2, window_bounds = array<i64: 1, 128>}]} {
    %c0 = arith.constant 0 : index
    %c0_0 = arith.constant 0 : index
    %0 = vector.load %arg1[%c0, %c0_0] : memref<4x128xf32, #tpu.memory_space<vmem>>, vector<4x128xf32>
    %cst = arith.constant dense<0.000000e+00> : vector<128xf32>
    %1 = vector.multi_reduction <add>, %0, %cst [0] : vector<4x128xf32> to vector<128xf32>
    %2 = vector.shape_cast %1 : vector<128xf32> to vector<1x128xf32>
    %c0_1 = arith.constant 0 : index
    %c0_2 = arith.constant 0 : index
    %3 = vector.load %arg4[%c0_1, %c0_2] : memref<1x256xf32, #tpu.memory_space<vmem>>, vector<1x128xf32>
    tpu.vector_store %arg4[%c0_1, %c0_2], %2 {strides = array<i32>} : memref<1x256xf32, #tpu.memory_space<vmem>>, vector<1x128xf32>,
    %c0_3 = arith.constant 0 : index
    %c0_4 = arith.constant 0 : index
    %4 = vector.load %arg2[%c0_3, %c0_4] : memref<4x128xf32, #tpu.memory_space<vmem>>, vector<4x128xf32>
    %cst_5 = arith.constant dense<0.000000e+00> : vector<128xf32>
    %5 = vector.multi_reduction <add>, %4, %cst_5 [0] : vector<4x128xf32> to vector<128xf32>
    %6 = vector.shape_cast %5 : vector<128xf32> to vector<1x128xf32>
    %c0_6 = arith.constant 0 : index
    %c128 = arith.constant 128 : index
    %7 = vector.load %arg4[%c0_6, %c128] : memref<1x256xf32, #tpu.memory_space<vmem>>, vector<1x128xf32>
    tpu.vector_store %arg4[%c0_6, %c128], %6 {strides = array<i32>} : memref<1x256xf32, #tpu.memory_space<vmem>>, vector<1x128xf32>,
    %c0_7 = arith.constant 0 : index
    %c0_8 = arith.constant 0 : index
    %8 = vector.load %arg4[%c0_7, %c0_8] : memref<1x256xf32, #tpu.memory_space<vmem>>, vector<1x128xf32>
    %c0_9 = arith.constant 0 : index
    %c1 = arith.constant 1 : index
    %9 = vector.load %arg4[%c0_9, %c1] : memref<1x256xf32, #tpu.memory_space<vmem>>, vector<1x128xf32>
    %10 = arith.addf %8, %9 : vector<1x128xf32>
    %cst_10 = arith.constant 1.250000e-01 : f32
    %11 = vector.broadcast %cst_10 : f32 to vector<1x128xf32>
    %12 = arith.mulf %10, %11 : vector<1x128xf32>
    %c0_11 = arith.constant 0 : index
    %c0_12 = arith.constant 0 : index
    %13 = vector.load %arg3[%c0_11, %c0_12] : memref<1x128xf32, #tpu.memory_space<vmem>>, vector<1x128xf32>
    tpu.vector_store %arg3[%c0_11, %c0_12], %12 {strides = array<i32>} : memref<1x128xf32, #tpu.memory_space<vmem>>, vector<1x128xf32>,
    return
  }
  func.func @transform_0(%arg0: i32) -> (i32, i32) {
    %c0_i32 = arith.constant 0 : i32
    %c0_i32_0 = arith.constant 0 : i32
    return %c0_i32, %arg0 : i32, i32
  }
  func.func @transform_1(%arg0: i32) -> (i32, i32) {
    %c1_i32 = arith.constant 1 : i32
    %0 = arith.addi %arg0, %c1_i32 : i32
    %c1_i32_0 = arith.constant 1 : i32
    %1 = arith.muli %0, %c1_i32_0 : i32
    %c0_i32 = arith.constant 0 : i32
    %c0_i32_1 = arith.constant 0 : i32
    return %c0_i32, %1 : i32, i32
  }
  func.func @transform_2(%arg0: i32) -> (i32, i32) {
    %c0_i32 = arith.constant 0 : i32
    %c0_i32_0 = arith.constant 0 : i32
    return %c0_i32, %arg0 : i32, i32
  }
}

</mosaic_0001>

<bundles_post_ra>
// kernel: label_alignment.1
= control target key start
LH: loop header
LB: loop body
LE: loop exit
PB: predicated region body
PF: predicated region fallthrough
CT: control target
= control target key end

     0   :  { %vm29_vm0 = vcmask 1043456   ;;  %v37_v10 = vlaneseq  ;;  %vm57_vm2 = vcmask 1039360   ;;  %s100_s0 = inlined_call_operand.vmem [shape: f32[4,256], index: 0, kind: input, shape index: {}, may-alias: {0,1}]   ;;  %s101_s1 = inlined_call_operand.vmem [shape: f32[4,256], index: 1, kind: input, shape index: {}, may-alias: {0,1}]   ;;  %s102_s2 = inlined_call_operand.vmem [shape: f32[1,128], index: 2, kind: output, shape index: {}]  }
   0x1   :  { %v28_v0 = vld [vmem:[%s100_s0] sm:$0xf]  ;;  %v73_v1 = vld [vmem:[%s101_s1 + $0x4] sm:$0xf]  ;;  %s75_s0 = smov 127  }
   0x2   :  { %v30_v2 = vsel %vm29_vm0, %v28_v0, 0.0  ;;  %v43_v3 = vsel %vm29_vm0, %v73_v1, 0.0  ;;  %vm39_vm1 = vcmp.lt.s32.totalorder %v37_v10, 128 }
   0x3   :  { %v31_v4 = vrot.slane %v30_v2, 4  ;;  %v44_v5 = vrot.slane %v43_v3, 4 }
   0x5   :  { %v32_v6 = vadd.f32 %v31_v4, %v30_v2  ;;  %v45_v7 = vadd.f32 %v44_v5, %v43_v3 }
   0x7   :  { %v33_v8 = vrot.slane %v32_v6, 2  ;;  %v46_v9 = vrot.slane %v45_v7, 2 }
   0x9   :  { %v34_v11 = vadd.f32 %v33_v8, %v32_v6  ;;  %v47_v12 = vadd.f32 %v46_v9, %v45_v7 }
   0xb   :  { %v35_v13 = vrot.slane %v34_v11, 1  ;;  %v48_v14 = vrot.slane %v47_v12, 1 }
   0xd   :  { %v36_v15 = vadd.f32 %v35_v13, %v34_v11  ;;  %v49_v16 = vadd.f32 %v48_v14, %v47_v12 }
   0xf   :  { %41 = vst.msk [vmem:[#allocation2] sm:$0x1] %vm39_vm1, %v36_v15  ;;  %50 = vst.msk [vmem:[#allocation2 + $0x1] sm:$0x1] %vm39_vm1, %v49_v16 }
  0x16   :  { %v52_v17 = vld [vmem:[#allocation2] sm:$0x3] }
  0x17   :  { %54 = vrot.lane.b32.xlu0 %v52_v17, %s75_s0  ;;  %v51_v19 = vld [vmem:[#allocation2] sm:$0x1] }
  0x89   :  { %v55_v18 = vpop.permute.xlu0 %54 }
  0x8a   :  { %v56_v20 = vrot.slane %v55_v18, 1 }
  0x8c   :  { %v58_v21 = vsel %vm57_vm2, %v55_v18, %v56_v20 }
  0x8d   :  { %v60_v22 = vadd.f32 %v58_v21, %v51_v19 }
  0x8f   :  { %v61_v23 = vmul.f32 0.125, %v60_v22 }
  0x91   :  { %62 = vst [vmem:[%s102_s2] sm:$0x1] %v61_v23 }

</bundles_post_ra>
